<compile_context>
chip_gen: v7x
topology: tpu7x:2x2x1
jax: 0.10.0
libtpu: 0.0.40
codegen_flags: <defaults>
</compile_context>

<pallas_src>
import functools
import math

import jax
import jax.numpy as jnp
from jax.experimental import pallas as pl
from jax.experimental.pallas import tpu as pltpu


# ----------------------------------------------------------------------------
# Kernel 1: K projection (rows of (B*S, E)), gridded over the row dimension.
# Operands arrive pre-cast to the matmul dtype; bias stays f32.
# ----------------------------------------------------------------------------
def _k_proj_kernel(x_ref, wk_ref, bk_ref, k_ref):
    acc = jnp.dot(x_ref[...], wk_ref[...], preferred_element_type=jnp.float32)
    k_ref[...] = (acc + bk_ref[...]).astype(k_ref.dtype)


# ----------------------------------------------------------------------------
# Kernel 2: fused Q|V projection + attention core + output projection.
# Processes BB batches per grid step (one block = (BB*S, E) rows).
# ----------------------------------------------------------------------------
def _attn_fused_kernel(x_ref, k2_ref, mask_ref,
                       wqv_ref, bqv_ref, wo_ref, bo_ref,
                       out_ref, w_ref, *, bb, seq, emb, mm_dtype):
    x = x_ref[...]                                            # (bb*seq, emb), mm_dtype

    # Fused Q|V projection: one MXU pass with N = 2E.  1/sqrt(E) is already
    # folded into the Q columns of wqv / bqv by the wrapper.
    qv = jnp.dot(x, wqv_ref[...],
                 preferred_element_type=jnp.float32) + bqv_ref[...]   # (bb*seq, 2E) f32
    q3 = qv[:, :emb].reshape(bb, seq, emb).astype(mm_dtype)   # (bb, seq, emb)
    v3 = qv[:, emb:].reshape(bb, seq, emb).astype(mm_dtype)   # (bb, seq, emb)

    k2 = k2_ref[...]                                          # (bb, emb, seq), mm_dtype

    # scores = q @ k_view  (k_view is the raw-reshaped key, per PyTorch .view)
    scores = jnp.einsum('bse,bet->bst', q3, k2,
                        preferred_element_type=jnp.float32)   # (bb, seq, seq)
    scores = jnp.where(mask_ref[...] == 0, jnp.float32(-1.0e9), scores)

    # Numerically stable softmax over keys; reciprocal goes to the EUP slot.
    # Note: fully-masked rows give uniform 1/S weights (same as the PyTorch ref).
    row_max = jnp.max(scores, axis=-1, keepdims=True)
    e = jnp.exp(scores - row_max)
    denom = jnp.sum(e, axis=-1, keepdims=True)
    w = e * pl.reciprocal(denom, approx=False)                # (bb, seq, seq) f32

    # Store weights immediately to shorten the live range of the S^2 tensors.
    w_ref[...] = w

    # Context + output projection (flattened slab keeps MXU M = bb*seq).
    ctx = jnp.einsum('bst,bte->bse', w.astype(mm_dtype), v3,
                     preferred_element_type=jnp.float32)      # (bb, seq, emb)
    out = jnp.dot(ctx.reshape(bb * seq, emb).astype(mm_dtype), wo_ref[...],
                  preferred_element_type=jnp.float32) + bo_ref[...]
    out_ref[...] = out                                        # (bb*seq, emb) f32


# ----------------------------------------------------------------------------
# Hardware / tiling helpers.
# ----------------------------------------------------------------------------
def _vmem_limit_bytes():
    """Generation-aware VMEM limit (v7x has 64 MiB physical, v5e/v6e 128 MiB)."""
    cap = None
    try:
        info = pltpu.get_tpu_info()
        cap = getattr(info, "vmem_capacity_bytes", None)
    except Exception:
        cap = None
    if not cap:
        cap = 128 * 1024 * 1024
    return int(min(cap * 3 // 4, 100 * 1024 * 1024))


@functools.lru_cache(maxsize=1)
def _supports_single_buffering():
    """Probe whether pipeline_mode=pl.Buffered(1) is available/accepted."""
    try:
        def _probe(a_ref, o_ref):
            o_ref[...] = a_ref[...] + 1.0

        fn = pl.pallas_call(
            _probe,
            grid=(2,),
            in_specs=[pl.BlockSpec((8, 128), lambda i: (0, 0),
                                   pipeline_mode=pl.Buffered(1))],
            out_specs=pl.BlockSpec((8, 128), lambda i: (i, 0)),
            out_shape=jax.ShapeDtypeStruct((16, 128), jnp.float32),
        )
        jax.block_until_ready(fn(jnp.zeros((8, 128), jnp.float32)))
        return True
    except Exception:
        return False


def _const_spec(shape, single_buffer):
    """BlockSpec for an operand whose block index never changes (weights/bias).
    Single-buffered when supported, since it is only fetched once."""
    nd = len(shape)
    idx = lambda *_: (0,) * nd
    if single_buffer:
        return pl.BlockSpec(shape, idx, pipeline_mode=pl.Buffered(1))
    return pl.BlockSpec(shape, idx)


def _largest_aligned_divisor(n, target, align):
    """Largest t <= target that divides n and is a multiple of `align`;
    falls back to n (full extent) if none exists."""
    t = min(n, target)
    t -= t % align
    while t >= align:
        if n % t == 0:
            return t
        t -= align
    return n


def _pick_row_tile(n_rows, emb, mm_bytes, vmem_budget, target=1024):
    """Row tile for the K-projection kernel: large (amortize per-step overhead,
    feed the MXU), VMEM-bounded, and >= 2 grid steps when possible."""
    align = 8
    per_row = 2 * emb * mm_bytes + 2 * emb * mm_bytes   # x in + k out, double-buffered
    cap_vmem = max(align, vmem_budget // max(per_row, 1))
    t = min(n_rows, target, cap_vmem)
    if n_rows >= 2 * align:
        t = min(t, n_rows // 2)                          # keep >= 2 grid steps
    return _largest_aligned_divisor(n_rows, t, align)


def _pick_batch_block(batch, seq, emb, mm_bytes, vmem_budget, target_rows=512):
    """Batches per attention grid step: enough flattened MXU rows, bounded by
    the (bb, S, S) intermediates' VMEM, and >= 2 grid steps when possible."""
    if seq % 8 != 0:
        return 1  # keep in-kernel reshapes trivial when seq is not sublane-aligned
    f32 = 4
    per_b = (2 * seq * emb * mm_bytes              # x block (double-buffered)
             + 2 * emb * seq * mm_bytes            # k2 block (double-buffered)
             + 2 * seq * seq * f32                 # weights output block (double-buffered)
             + 2 * seq * emb * f32                 # output block (double-buffered)
             + 2 * seq * emb * f32                 # qv intermediate (2E columns)
             + 3 * seq * seq * f32                 # scores / e / w live values
             + 2 * seq * emb * (f32 + mm_bytes))   # q3 / v3 + matmul-dtype copies
    cap_vmem = max(1, vmem_budget // max(per_b, 1))
    bb = max(1, min(batch, cap_vmem, max(1, target_rows // max(seq, 1))))
    if batch >= 2:
        bb = min(bb, max(1, batch // 2))           # keep >= 2 grid steps (pipelining / megacore)
    while batch % bb:
        bb -= 1
    return bb
    # TODO(synk): for very large S where even bb=1 exceeds the budget, tile the
    # key dimension inside the kernel (two-pass max/sum) instead of shrinking bb.


# ----------------------------------------------------------------------------
# Wrapper.
# ----------------------------------------------------------------------------
def attention_forward(x, mask, params, *, use_bf16_matmul=True):
    """Pallas implementation of Attention.forward(x, mask) -> (output, weights).

    use_bf16_matmul=True (default): bf16 MXU operands, f32 accumulation.
    use_bf16_matmul=False: exact-precision reference mode (f32 operands).
    """
    B, S, E = x.shape
    mm_dtype = jnp.bfloat16 if use_bf16_matmul else jnp.float32
    mm_bytes = jnp.dtype(mm_dtype).itemsize
    scale = 1.0 / math.sqrt(E)

    wq, bq = params["wq"], params["bq"]
    wk, bk = params["wk"], params["bk"]
    wv, bv = params["wv"], params["bv"]
    wo, bo = params["wo"], params["bo"]

    # One-time wrapper-side prep: transposes, 1/sqrt(E) fold into Q, Q|V weight
    # fusion, and dtype casts (so kernels never re-cast constant operands).
    wkT = wk.T.astype(mm_dtype)                                        # (E, E)
    bk2 = bk.reshape(1, E).astype(jnp.float32)
    wqvT = jnp.concatenate([wq.T * scale, wv.T], axis=1).astype(mm_dtype)  # (E, 2E)
    bqv = jnp.concatenate([bq * scale, bv]).reshape(1, 2 * E).astype(jnp.float32)
    woT = wo.T.astype(mm_dtype)                                        # (E, E)
    bo2 = bo.reshape(1, E).astype(jnp.float32)

    n_rows = B * S
    x2d = x.reshape(n_rows, E).astype(mm_dtype)

    vmem_limit = _vmem_limit_bytes()
    budget = vmem_limit // 2                 # rough budget for tiling estimates
    single_buf = _supports_single_buffering()

    # --- Kernel 1: K projection, gridded & pipelined over rows ----------------
    tm = _pick_row_tile(n_rows, E, mm_bytes, budget)
    k2d = pl.pallas_call(
        _k_proj_kernel,
        grid=(n_rows // tm,),
        in_specs=[
            pl.BlockSpec((tm, E), lambda i: (i, 0)),     # x row tile
            _const_spec((E, E), single_buf),             # Wk^T (shared, single-buffered)
            _const_spec((1, E), single_buf),             # bk   (shared, single-buffered)
        ],
        out_specs=pl.BlockSpec((tm, E), lambda i: (i, 0)),
        out_shape=jax.ShapeDtypeStruct((n_rows, E), mm_dtype),  # bf16 round-trip in fast path
        compiler_params=pltpu.CompilerParams(
            dimension_semantics=("parallel",),
            vmem_limit_bytes=vmem_limit),
    )(x2d, wkT, bk2)

    # PyTorch's `k.view(-1, E, S)`: raw reshape of the contiguous (B, S, E) key
    # buffer into (B, E, S) -- NOT a transpose.  Done by XLA between kernels.
    k2 = k2d.reshape(B, E, S)

    # mask.unsqueeze(1).view(-1, 1, S)
    mask3 = mask.reshape(B, 1, S).astype(jnp.float32)

    # --- Kernel 2: fused Q|V proj + attention + output projection -------------
    bb = _pick_batch_block(B, S, E, mm_bytes, budget)
    kernel = functools.partial(_attn_fused_kernel,
                               bb=bb, seq=S, emb=E, mm_dtype=mm_dtype)
    out2d, weights = pl.pallas_call(
        kernel,
        grid=(B // bb,),
        in_specs=[
            pl.BlockSpec((bb * S, E), lambda b: (b, 0)),    # x rows for batch blk
            pl.BlockSpec((bb, E, S), lambda b: (b, 0, 0)),  # "view"-reshaped key
            pl.BlockSpec((bb, 1, S), lambda b: (b, 0, 0)),  # mask
            _const_spec((E, 2 * E), single_buf),            # [Wq^T*scale | Wv^T]
            _const_spec((1, 2 * E), single_buf),            # [bq*scale | bv]
            _const_spec((E, E), single_buf),                # Wo^T
            _const_spec((1, E), single_buf),                # bo
        ],
        out_specs=[
            pl.BlockSpec((bb * S, E), lambda b: (b, 0)),    # output (2D row slab)
            pl.BlockSpec((bb, S, S), lambda b: (b, 0, 0)),  # attention weights
        ],
        out_shape=(
            jax.ShapeDtypeStruct((n_rows, E), jnp.float32),
            jax.ShapeDtypeStruct((B, S, S), jnp.float32),
        ),
        compiler_params=pltpu.CompilerParams(
            dimension_semantics=("parallel",),
            vmem_limit_bytes=vmem_limit),
    )(x2d, k2, mask3, wqvT, bqv, woT, bo2)

    return out2d.reshape(B, S, E), weights


# ----------------------------------------------------------------------------
# Pure-JAX reference (faithful to the PyTorch graph, incl. the k.view reshape).
# ----------------------------------------------------------------------------
def _reference_forward(x, mask, params):
    B, S, E = x.shape
    q = x @ params["wq"].T + params["bq"]
    k = x @ params["wk"].T + params["bk"]
    v = x @ params["wv"].T + params["bv"]
    k2 = k.reshape(-1, E, S)
    w = jnp.matmul(q, k2) / math.sqrt(E)
    m = mask.reshape(-1, 1, S)
    w = jnp.where(m == 0, jnp.float32(-1.0e9), w)
    w = jax.nn.softmax(w, axis=-1)
    out = jnp.matmul(w, v)
    out = out @ params["wo"].T + params["bo"]
    return out, w


def init_params(key, embedding_dim):
    """Deterministic parameter init matching nn.Linear shapes (out, in) / (out,)."""
    E = embedding_dim
    ks = jax.random.split(key, 8)
    bound = 1.0 / math.sqrt(E)

    def u(k, shape):
        return jax.random.uniform(k, shape, jnp.float32, -bound, bound)

    return {
        "wq": u(ks[0], (E, E)), "bq": u(ks[1], (E,)),
        "wk": u(ks[2], (E, E)), "bk": u(ks[3], (E,)),
        "wv": u(ks[4], (E, E)), "bv": u(ks[5], (E,)),
        "wo": u(ks[6], (E, E)), "bo": u(ks[7], (E,)),
    }


if __name__ == "__main__":
    B, S, E = 2, 8, 32
    key = jax.random.PRNGKey(0)
    kx, kp = jax.random.split(key, 2)

    x = jax.random.normal(kx, (B, S, E), dtype=jnp.float32)
    # mask: 1 for valid tokens, 0 for padding (second sequence has 5 valid tokens)
    lengths = jnp.array([8, 5], dtype=jnp.int32)
    mask = (jnp.arange(S)[None, :] < lengths[:, None]).astype(jnp.float32)

    params = init_params(kp, E)
    ref_out, ref_w = _reference_forward(x, mask, params)

    # Default fast path: bf16 MXU operands (f32 accumulation) -> relaxed tolerances.
    out, weights = attention_forward(x, mask, params)
    jax.block_until_ready((out, weights))

    assert out.shape == (B, S, E)
    assert weights.shape == (B, S, S)
    assert bool(jnp.all(jnp.isfinite(out)))
    # softmax rows sum to 1 (softmax itself is computed in f32, exact reciprocal)
    assert bool(jnp.allclose(jnp.sum(weights, axis=-1), 1.0, atol=1e-5))
    assert bool(jnp.allclose(out, ref_out, atol=5e-2, rtol=5e-2))
    assert bool(jnp.allclose(weights, ref_w, atol=3e-2, rtol=3e-2))

    # Exact-precision reference mode: f32 operands -> tight tolerances.
    out32, w32 = attention_forward(x, mask, params, use_bf16_matmul=False)
    jax.block_until_ready((out32, w32))
    assert bool(jnp.allclose(out32, ref_out, atol=1e-4, rtol=1e-4))
    assert bool(jnp.allclose(w32, ref_w, atol=1e-5, rtol=1e-4))

    print("KERNEL_OK")
</pallas_src>

<mosaic_0001>
module attributes {stable_mosaic.version = 11 : i64} {
  func.func @_probe(%arg0: i32, %arg1: memref<8x128xf32, #tpu.memory_space<vmem>>, %arg2: memref<8x128xf32, #tpu.memory_space<vmem>>) attributes {dimension_semantics = [#tpu.dimension_semantics<arbitrary>], iteration_bounds = array<i64: 2>, scalar_prefetch = 0 : i64, scratch_operands = 0 : i64, tpu.core_type = #tpu.core_type<tc>, window_params = [{pipeline_mode = #tpu.pipeline_mode<synchronous>, transform_indices = @transform_0, window_bounds = array<i64: 8, 128>}, {transform_indices = @transform_1, window_bounds = array<i64: 8, 128>}]} {
    %c0 = arith.constant 0 : index
    %c0_0 = arith.constant 0 : index
    %0 = vector.load %arg1[%c0, %c0_0] : memref<8x128xf32, #tpu.memory_space<vmem>>, vector<8x128xf32>
    %cst = arith.constant 1.000000e+00 : f32
    %1 = vector.broadcast %cst : f32 to vector<8x128xf32>
    %2 = arith.addf %0, %1 : vector<8x128xf32>
    %c0_1 = arith.constant 0 : index
    %c0_2 = arith.constant 0 : index
    %3 = vector.load %arg2[%c0_1, %c0_2] : memref<8x128xf32, #tpu.memory_space<vmem>>, vector<8x128xf32>
    tpu.vector_store %arg2[%c0_1, %c0_2], %2 {strides = array<i32>} : memref<8x128xf32, #tpu.memory_space<vmem>>, vector<8x128xf32>,
    return
  }
  func.func @transform_0(%arg0: i32) -> (i32, i32) {
    %c0_i32 = arith.constant 0 : i32
    %c0_i32_0 = arith.constant 0 : i32
    %c0_i32_1 = arith.constant 0 : i32
    return %c0_i32, %c0_i32_0 : i32, i32
  }
  func.func @transform_1(%arg0: i32) -> (i32, i32) {
    %c0_i32 = arith.constant 0 : i32
    %c0_i32_0 = arith.constant 0 : i32
    return %arg0, %c0_i32 : i32, i32
  }
}

module attributes {stable_mosaic.version = 11 : i64} {
  func.func @_k_proj_kernel(%arg0: i32, %arg1: memref<8x32xbf16, #tpu.memory_space<vmem>>, %arg2: memref<32x32xbf16, #tpu.memory_space<vmem>>, %arg3: memref<1x32xf32, #tpu.memory_space<vmem>>, %arg4: memref<8x32xbf16, #tpu.memory_space<vmem>>) attributes {dimension_semantics = [#tpu.dimension_semantics<parallel>], iteration_bounds = array<i64: 2>, scalar_prefetch = 0 : i64, scratch_operands = 0 : i64, tpu.core_type = #tpu.core_type<tc>, window_params = [{transform_indices = @transform_0, window_bounds = array<i64: 8, 32>}, {pipeline_mode = #tpu.pipeline_mode<synchronous>, transform_indices = @transform_1, window_bounds = array<i64: 32, 32>}, {pipeline_mode = #tpu.pipeline_mode<synchronous>, transform_indices = @transform_2, window_bounds = array<i64: 1, 32>}, {transform_indices = @transform_3, window_bounds = array<i64: 8, 32>}]} {
    %c0 = arith.constant 0 : index
    %c0_0 = arith.constant 0 : index
    %0 = vector.load %arg1[%c0, %c0_0] : memref<8x32xbf16, #tpu.memory_space<vmem>>, vector<8x32xbf16>
    %c0_1 = arith.constant 0 : index
    %c0_2 = arith.constant 0 : index
    %1 = vector.load %arg2[%c0_1, %c0_2] : memref<32x32xbf16, #tpu.memory_space<vmem>>, vector<32x32xbf16>
    %cst = arith.constant dense<0.000000e+00> : vector<8x32xf32>
    %2 = tpu.matmul %0, %1, %cst {dimension_numbers = #tpu.dot_dimension_numbers<[1], [0], [0], [1], [0, 0, 1, 1], [], []>} : vector<8x32xbf16>, vector<32x32xbf16>, vector<8x32xf32> -> vector<8x32xf32>
    %c0_3 = arith.constant 0 : index
    %c0_4 = arith.constant 0 : index
    %3 = vector.load %arg3[%c0_3, %c0_4] : memref<1x32xf32, #tpu.memory_space<vmem>>, vector<1x32xf32>
    %4 = vector.broadcast %3 : vector<1x32xf32> to vector<8x32xf32>
    %5 = arith.addf %2, %4 : vector<8x32xf32>
    %6 = arith.truncf %5 : vector<8x32xf32> to vector<8x32xbf16>
    %c0_5 = arith.constant 0 : index
    %c0_6 = arith.constant 0 : index
    %7 = vector.load %arg4[%c0_5, %c0_6] : memref<8x32xbf16, #tpu.memory_space<vmem>>, vector<8x32xbf16>
    tpu.vector_store %arg4[%c0_5, %c0_6], %6 {strides = array<i32>} : memref<8x32xbf16, #tpu.memory_space<vmem>>, vector<8x32xbf16>,
    return
  }
  func.func @transform_0(%arg0: i32) -> (i32, i32) {
    %c0_i32 = arith.constant 0 : i32
    %c0_i32_0 = arith.constant 0 : i32
    return %arg0, %c0_i32 : i32, i32
  }
  func.func @transform_1(%arg0: i32) -> (i32, i32) {
    %c0_i32 = arith.constant 0 : i32
    %c0_i32_0 = arith.constant 0 : i32
    %c0_i32_1 = arith.constant 0 : i32
    return %c0_i32, %c0_i32_0 : i32, i32
  }
  func.func @transform_2(%arg0: i32) -> (i32, i32) {
    %c0_i32 = arith.constant 0 : i32
    %c0_i32_0 = arith.constant 0 : i32
    %c0_i32_1 = arith.constant 0 : i32
    return %c0_i32, %c0_i32_0 : i32, i32
  }
  func.func @transform_3(%arg0: i32) -> (i32, i32) {
    %c0_i32 = arith.constant 0 : i32
    %c0_i32_0 = arith.constant 0 : i32
    return %arg0, %c0_i32 : i32, i32
  }
}

</mosaic_0001>

<bundles_post_ra>
// kernel: tpu_custom_call.1
= control target key start
LH: loop header
LB: loop body
LE: loop exit
PB: predicated region body
PF: predicated region fallthrough
CT: control target
= control target key end

     0   :  { %6 = vsyncpa [#allocation3], 0  ;;  %s482_s0 = inlined_call_operand.hbm [shape: f32[8,128], index: 0, kind: input, shape index: {}]   ;;  %s483_s1 = inlined_call_operand.hbm [shape: f32[16,128], index: 1, kind: output, shape index: {}]  }
   0x1   :  { %7 = vsyncpa [#allocation4], 0 }
   0x2   :  { %9 = vsyncpa [#allocation4 + $0x1], 0  ;;  %s352_s6 = smov 0   ;;  %s354_s7 = smov 0  }
   0x3   :  { %s356_s8 = smov 0   ;;  %s358_s9 = smov 0  }
   0x4 LB: > { %s373_s10 = sadd.s32 4294967295, %s338_s9   ;;  %s184_s11 = sadd.s32 4294967294, %s338_s9   ;;  %s338_s9 = sphi %s358_s9, %s499_s9   ;;  %s334_s8 = sphi %s356_s8, %s498_s8   ;;  %s330_s7 = sphi %s354_s7, %s497_s7   ;;  %s326_s6 = sphi %s352_s6, %s496_s6  }
   0x5   : > { %s377_s12 = sadd.s32 1, %s338_s9   ;;  %s43_s13 = sadd.s32 1, %s334_s8 }
   0x6   : > { %s40_s14 = ssub.s32 %s338_s9, %s377_s12  ;;  %p53_p0 = scmp.ne.s32.totalorder %s334_s8, %s330_s7 }
   0x7   : > { %p41_p1 = scmp.eq.s32.totalorder %s40_s14, 0  ;;  %p54_p2 = scmp.eq.s32.totalorder %s373_s10, 1 }
   0x8   : > { %p59_p3 = scmp.ne.s32.totalorder %s330_s7, %s326_s6  ;;  %p60_p4 = scmp.eq.s32.totalorder %s184_s11, 1 }
   0x9   : > { %s388_s15 = scalar_select %p41_p1, %s334_s8, %s43_s13  }
   0xa   : > { %p390_p5 = por %p54_p2, %p53_p0  ;;  %p394_p6 = por %p60_p4, %p59_p3 }
   0xb   : > { %p185_p7 = scmp.ge.s32.totalorder %s338_s9, 1  ;;  %p67_p8 = scmp.lt.s32.totalorder %s338_s9, 3 }
   0xc   : > { %s487_s16 = scalar_select %p390_p5, 1, 0 }
   0xd   : > { %s488_s17 = scalar_select %p394_p6, 1, 0 }
   0xe   : > { %p484_p9 = scmp.eq.s32.totalorder %s373_s10, 0  ;;  %p401_p10 = pnand %p185_p7, %p67_p8 }
   0xf   : > { %s340_s19 = smov [#allocation2]   ;;  %s244_s24 = scalar_lea.hbm %s482_s0, 128 }
  0x10   : > { %s489_s18 = scalar_select %p401_p10, 1, 0 }
  0x11   : > { %s80_s20 = sshll.u32 %s340_s19, 4  ;;  %p200_p11 = pneg %p401_p10  ;;  %s81_s20 = int_to_ptr.vmem [resolvable:$true] %s80_s20 }
  0x12   : > { %p245_p13 = scmp.ne.s32.totalorder %s482_s0, %s244_s24  ;;  %p251_p3 = scmp.lt.u32.totalorder %s244_s24, %s482_s0 }
  0x13   : > { %p409_p12 = pnand %p484_p9, %p200_p11 }
  0x15   : > { %p246_p0 = pneg %p409_p12 }
  0x17   : > { %p247_p1 = pnand %p246_p0, %p245_p13 }
  0x19   : > { %p248_p2 = pneg %p247_p1 }
  0x1b   : > { %p253_p4 = pnand %p251_p3, %p248_p2 }
  0x1d   : > { %256 = shalt.err (!%p253_p4)
}
  0x1e   : > { %s257_s29 = scalar_lea.vmem %s81_s20, 128  ;;  %p265_p9 = scmp.lt.s32.totalorder %s81_s20, %s81_s20 }
  0x1f   : > { %p258_p7 = scmp.ne.s32.totalorder %s81_s20, %s257_s29  ;;  %p266_p6 = scmp.lt.s32.totalorder %s257_s29, %s257_s29 }
  0x21   : > { %p260_p8 = pnand %p258_p7, %p246_p0  ;;  %p267_p5 = por %p266_p6, %p265_p9 }
  0x23   : > { %p261_p11 = pneg %p260_p8 }
  0x25   : > { %p268_p10 = pnand %p267_p5, %p261_p11 }
  0x27   : > { %271 = shalt.err (!%p268_p10)
}
  0x28   : > { %203 = dma.hbm_to_vmem [thread:$0]  (!%p409_p12), %s482_s0, 128, %s81_s20, [#allocation3]  }
  0x29   : > { %p491_p13 = scmp.ne.s32.totalorder %s489_s18, 0 }
  0x2a   : > { %p492_p1 = scmp.eq.s32.totalorder (!%p491_p13), %s373_s10, 0 }
  0x2b   : > { %93 = sbr.rel (%p491_p13) target bundleno = 77 (0x4d), region = 24 }
  0x32   : > { %317 = dma.done.wait (%p492_p1), [#allocation3], 128   ;;  %p493_p0 = pmov %p492_p1 }
  0x33   : > { %s105_s3 = sand.u32 1, %s330_s7   ;;  %s191_s13 = sshll.u32 %s373_s10, 7  ;;  %v108_v0 = vld [vmem:[#allocation2] sm:$0xff] }
  0x34   : > { %319 = vsyncadd (%p493_p0), [#allocation3], 4294967168  ;;  %s189_s4 = sshll.u32 %s105_s3, 3  ;;  %v109_v1 = vadd.f32 1.0, %v108_v0  ;;  %s442_s19 = scalar_lea.hbm %s483_s1, %s191_s13 }
  0x35   : > { %s107_s5 = scalar_lea.vmem [#allocation5], %s189_s4  ;;  %s112_s20 = scalar_lea.sflag [#allocation4], %s105_s3 }
  0x36   : > { %s125_s11 = sshll.u32 %s107_s5, 4  ;;  %110 = vst [vmem:[%s107_s5] sm:$0xff] %v109_v1  ;;  %p494_p6 = scmp.ne.s32.totalorder %s487_s16, 0  ;;  %s437_s11 = int_to_ptr.vmem [resolvable:$true] %s125_s11 }
  0x37   : > { %s272_s21 = scalar_lea.vmem %s437_s11, 128  ;;  %s341_s10 = smov [#allocation5]  }
  0x38   : > { %p273_p5 = scmp.ne.s32.totalorder %s437_s11, %s272_s21  ;;  %s276_s22 = sshll.u32 %s341_s10, 4  ;;  %s277_s22 = int_to_ptr.vmem [resolvable:$false] %s276_s22 }
  0x39   : > { %s278_s23 = scalar_lea.vmem %s277_s22, 256  ;;  %p279_p12 = scmp.lt.s32.totalorder %s437_s11, %s277_s22 }
  0x3a   : > { %p274_p9 = pnand %p273_p5, %p494_p6  ;;  %p280_p2 = scmp.lt.s32.totalorder %s278_s23, %s272_s21 }
  0x3c   : > { %p275_p10 = pneg %p274_p9  ;;  %p281_p3 = por %p280_p2, %p279_p12 }
  0x3e   : > { %p282_p4 = pnand %p281_p3, %p275_p10 }
  0x40   : > { %285 = shalt.err (!%p282_p4)
}
  0x41   : > { %s286_s24 = scalar_lea.hbm %s442_s19, 128  ;;  %s290_s27 = scalar_lea.hbm %s483_s1, 256 }
  0x42   : > { %p287_p7 = scmp.ne.s32.totalorder %s442_s19, %s286_s24  ;;  %p291_p13 = scmp.lt.u32.totalorder %s442_s19, %s483_s1 }
  0x43   : > { %p292_p1 = scmp.lt.u32.totalorder %s290_s27, %s286_s24  ;;  %p294_p5 = scmp.lt.u32.totalorder %s286_s24, %s442_s19 }
  0x44   : > { %p288_p8 = pnand %p287_p7, %p494_p6 }
  0x45   : > { %p293_p0 = por %p292_p1, %p291_p13 }
  0x46   : > { %p289_p11 = pneg %p288_p8 }
  0x47   : > { %p295_p9 = por %p294_p5, %p293_p0 }
  0x49   : > { %p296_p10 = pnand %p295_p9, %p289_p11 }
  0x4b   : > { %299 = shalt.err (!%p296_p10)
}
  0x4c   : > { %198 = dma.vmem_to_hbm [thread:$0]  (%p494_p6), %s437_s11, 128, %s442_s19, %s112_s20  }
  0x4d PF: > { %p210_p12 = scmp.ge.s32.totalorder %s338_s9, 2  ;;  %s137_s30 = sand.u32 1, %s326_s6  }
  0x4e   : > { %p495_p2 = scmp.ne.s32.totalorder %s488_s17, 0  ;;  %s138_s2 = scalar_lea.sflag [#allocation4], %s137_s30 }
  0x50   : > { %p205_p3 = pnand %p210_p12, %p495_p2 }
  0x52   : > { %321 = dma.done.wait (!%p205_p3), %s138_s2, 128  }
  0x53   : > { %323 = vsyncadd (!%p205_p3), %s138_s2, 4294967168  ;;  %p12_p4 = scmp.ge.s32.totalorder %s377_s12, 4   ;;  %s496_s6 = smov %s330_s7 }
  0x54   : > { %s497_s7 = smov %s334_s8  ;;  %s498_s8 = smov %s388_s15 }
  0x55   : > { %s499_s9 = smov %s377_s12  ;;  %14 = sbr.rel (!%p12_p4) target bundleno = 4 (0x4), region = 61 }
  0x5c   :  { %143 = vsyncpa [#allocation3], 1 }
  0x5d   :  { %145 = vsyncpa [#allocation3 + $0x1], 1 }
  0x5e   :  { %146 = vsyncpa [#allocation4], 1 }
  0x5f   :  { %148 = vsyncpa [#allocation4 + $0x1], 1 }

// kernel: tpu_custom_call.1
= control target key start
LH: loop header
LB: loop body
LE: loop exit
PB: predicated region body
PF: predicated region fallthrough
CT: control target
= control target key end

     0   :  { %8 = vsyncpa [#allocation3], 0  ;;  %s908_s0 = inlined_call_operand.hbm [shape: bf16[16,32], index: 0, kind: input, shape index: {}]   ;;  %s909_s1 = inlined_call_operand.hbm [shape: bf16[32,32], index: 1, kind: input, shape index: {}]   ;;  %s910_s2 = inlined_call_operand.hbm [shape: f32[1,32], index: 2, kind: input, shape index: {}]   ;;  %s911_s3 = inlined_call_operand.hbm [shape: bf16[16,32], index: 3, kind: output, shape index: {}]  }
   0x1   :  { %10 = vsyncpa [#allocation3 + $0x1], 0 }
   0x2   :  { %11 = vsyncpa [#allocation6], 0 }
   0x3   :  { %12 = vsyncpa [#allocation4], 0 }
   0x4   :  { %14 = vsyncpa [#allocation4 + $0x1], 0  ;;  %s678_s12 = smov 0   ;;  %s680_s13 = smov 0  }
   0x5   :  { %s682_s14 = smov 0   ;;  %s684_s15 = smov 0  }
   0x6 LB: > { %s699_s16 = sadd.s32 4294967295, %s648_s15   ;;  %s388_s17 = sadd.s32 4294967294, %s648_s15   ;;  %s648_s15 = sphi %s684_s15, %s931_s15   ;;  %s644_s14 = sphi %s682_s14, %s930_s14   ;;  %s640_s13 = sphi %s680_s13, %s929_s13   ;;  %s636_s12 = sphi %s678_s12, %s928_s12  }
   0x7   : > { %p40_p0 = scmp.ne.s32.totalorder %s640_s13, %s636_s12  ;;  %p912_p1 = scmp.eq.s32.totalorder %s699_s16, 0 }
   0x8   : > { %p112_p3 = scmp.eq.s32.totalorder %s388_s17, 1  ;;  %p389_p5 = scmp.ge.s32.totalorder %s648_s15, 1 }
   0x9   : > { %p708_p4 = por %p912_p1, %p40_p0  ;;  %p119_p7 = scmp.lt.s32.totalorder %s648_s15, 3 }
   0xa   : > { %p713_p6 = por %p112_p3, %p40_p0  ;;  %s650_s21 = smov [#allocation5]  }
   0xb   : > { %s915_s18 = scalar_select %p708_p4, 1, 0 }
   0xc   : > { %s916_s19 = scalar_select %p713_p6, 1, 0 }
   0xd   : > { %p718_p8 = pnand %p389_p5, %p119_p7  ;;  %s131_s22 = sshll.u32 %s650_s21, 4  ;;  %s722_s22 = int_to_ptr.vmem [resolvable:$true] %s131_s22 }
   0xe   : > { %s651_s24 = smov [#allocation7]   ;;  %s492_s28 = scalar_lea.hbm %s909_s1, 256 }
   0xf   : > { %p431_p9 = pneg %p718_p8  ;;  %s145_s25 = sshll.u32 %s651_s24, 4  ;;  %s733_s25 = int_to_ptr.vmem [resolvable:$true] %s145_s25 }
  0x10   : > { %p493_p12 = scmp.ne.s32.totalorder %s909_s1, %s492_s28  ;;  %p499_p5 = scmp.lt.u32.totalorder %s492_s28, %s909_s1 }
  0x11   : > { %p729_p11 = pnand %p431_p9, %p912_p1 }
  0x13   : > { %p494_p13 = pneg %p729_p11 }
  0x15   : > { %p495_p0 = pnand %p494_p13, %p493_p12 }
  0x17   : > { %p496_p3 = pneg %p495_p0 }
  0x19   : > { %p501_p7 = pnand %p499_p5, %p496_p3 }
  0x1b   : > { %504 = shalt.err (!%p501_p7)
}
  0x1c   : > { %s505_s6 = scalar_lea.vmem %s722_s22, 256  ;;  %p513_p2 = scmp.lt.s32.totalorder %s722_s22, %s722_s22 }
  0x1d   : > { %p506_p9 = scmp.ne.s32.totalorder %s722_s22, %s505_s6  ;;  %p514_p12 = scmp.lt.s32.totalorder %s505_s6, %s505_s6 }
  0x1f   : > { %p508_p10 = pnand %p506_p9, %p494_p13  ;;  %p515_p0 = por %p514_p12, %p513_p2 }
  0x21   : > { %p509_p1 = pneg %p508_p10 }
  0x23   : > { %p516_p6 = pnand %p515_p0, %p509_p1 }
  0x25   : > { %519 = shalt.err (!%p516_p6)
}
  0x26   : > { %s652_s7 = smov 64   ;;  %s653_s8 = smov 4  }
  0x27   : > { %434 = dma.hbm_to_vmem [thread:$0]  (!%p729_p11), %s909_s1, 256, %s722_s22, [#allocation6], %s652_s7, %s652_s7, %s653_s8  }
  0x28   : > { %s520_s21 = scalar_lea.hbm %s910_s2, 16 }
  0x29   : > { %p521_p2 = scmp.ne.s32.totalorder %s910_s2, %s520_s21  ;;  %p527_p10 = scmp.lt.u32.totalorder %s520_s21, %s910_s2 }
  0x2b   : > { %p523_p1 = pnand %p521_p2, %p494_p13 }
  0x2d   : > { %p524_p6 = pneg %p523_p1 }
  0x2f   : > { %p529_p3 = pnand %p527_p10, %p524_p6 }
  0x31   : > { %532 = shalt.err (!%p529_p3)
}
  0x32   : > { %s533_s22 = scalar_lea.vmem %s733_s25, 16  ;;  %s540_s29 = scalar_lea.vmem %s733_s25, 32 }
  0x33   : > { %p534_p5 = scmp.ne.s32.totalorder %s733_s25, %s533_s22  ;;  %p541_p12 = scmp.lt.s32.totalorder %s733_s25, %s733_s25 }
  0x34   : > { %p542_p0 = scmp.lt.s32.totalorder %s540_s29, %s533_s22 }
  0x35   : > { %p536_p7 = pnand %p534_p5, %p494_p13 }
  0x36   : > { %p543_p2 = por %p542_p0, %p541_p12 }
  0x37   : > { %p537_p9 = pneg %p536_p7 }
  0x39   : > { %p544_p1 = pnand %p543_p2, %p537_p9 }
  0x3b   : > { %547 = shalt.err (!%p544_p1)
}
  0x3c   : > { %437 = dma.hbm_to_vmem [thread:$0]  (!%p729_p11), %s910_s2, 16, %s733_s25, [#allocation6]  }
  0x3d   : > { %s789_s5 = sadd.s32 1, %s648_s15   ;;  %s27_s23 = sadd.s32 1, %s644_s14 }
  0x3e   : > { %s24_s6 = ssub.s32 %s648_s15, %s789_s5  ;;  %p34_p13 = scmp.ne.s32.totalorder %s644_s14, %s640_s13 }
  0x3f   : > { %p25_p6 = scmp.eq.s32.totalorder %s24_s6, 0  ;;  %p35_p10 = scmp.eq.s32.totalorder %s648_s15, 0 }
  0x40   : > { %p919_p3 = scmp.eq.s32.totalorder %s699_s16, 1  ;;  %p448_p7 = scmp.lt.s32.totalorder %s648_s15, 2 }
  0x41   : > { %s805_s8 = scalar_select %p25_p6, %s644_s14, %s27_s23  }
  0x42   : > { %p799_p5 = por %p919_p3, %p34_p13  ;;  %p36_p9 = por %p35_p10, %p34_p13 }
  0x43   : > { %s156_s9 = sand.u32 1, %s644_s14   ;;  %s394_s25 = sshll.u32 %s648_s15, 6 }
  0x44   : > { %s920_s7 = scalar_select %p799_p5, 1, 0 }
  0x45   : > { %s393_s10 = sshll.u32 %s156_s9, 2  ;;  %s812_s21 = scalar_lea.hbm %s908_s0, %s394_s25 }
  0x46   : > { %s160_s24 = scalar_lea.vmem [#allocation2], %s393_s10  ;;  %p816_p11 = pnand %p448_p7, %p36_p9 }
  0x47   : > { %s167_s26 = sshll.u32 %s160_s24, 4  ;;  %s157_s28 = scalar_lea.sflag [#allocation3], %s156_s9  ;;  %s814_s26 = int_to_ptr.vmem [resolvable:$true] %s167_s26 }
  0x48   : > { %s548_s22 = scalar_lea.hbm %s812_s21, 64  ;;  %p550_p0 = pneg %p816_p11 }
  0x49   : > { %p549_p12 = scmp.ne.s32.totalorder %s812_s21, %s548_s22  ;;  %s553_s4 = scalar_lea.hbm %s908_s0, 128 }
  0x4a   : > { %p554_p13 = scmp.lt.u32.totalorder %s812_s21, %s908_s0  ;;  %p555_p6 = scmp.lt.u32.totalorder %s553_s4, %s548_s22 }
  0x4b   : > { %p551_p2 = pnand %p550_p0, %p549_p12  ;;  %p557_p3 = scmp.lt.u32.totalorder %s548_s22, %s812_s21 }
  0x4c   : > { %p556_p10 = por %p555_p6, %p554_p13 }
  0x4d   : > { %p552_p1 = pneg %p551_p2 }
  0x4e   : > { %p558_p7 = por %p557_p3, %p556_p10 }
  0x50   : > { %p559_p9 = pnand %p558_p7, %p552_p1 }
  0x52   : > { %562 = shalt.err (!%p559_p9)
}
  0x53   : > { %s563_s9 = scalar_lea.vmem %s814_s26, 64  ;;  %s654_s10 = smov [#allocation2]  }
  0x54   : > { %p564_p12 = scmp.ne.s32.totalorder %s814_s26, %s563_s9  ;;  %s568_s25 = sshll.u32 %s654_s10, 4  ;;  %s569_s25 = int_to_ptr.vmem [resolvable:$false] %s568_s25 }
  0x55   : > { %s570_s11 = scalar_lea.vmem %s569_s25, 128  ;;  %p571_p4 = scmp.lt.s32.totalorder %s814_s26, %s569_s25 }
  0x56   : > { %p566_p2 = pnand %p564_p12, %p550_p0  ;;  %p572_p13 = scmp.lt.s32.totalorder %s570_s11, %s563_s9 }
  0x58   : > { %p567_p5 = pneg %p566_p2  ;;  %p573_p6 = por %p572_p13, %p571_p4 }
  0x5a   : > { %p574_p10 = pnand %p573_p6, %p567_p5 }
  0x5c   : > { %577 = shalt.err (!%p574_p10)
}
  0x5d   : > { %441 = dma.hbm_to_vmem [thread:$0]  (!%p816_p11), %s812_s21, 64, %s814_s26, %s157_s28  }
  0x5e   : > { %176 = sbr.rel (%p718_p8) target bundleno = 344 (0x158), region = 32  ;;  %s848_s17 = sand.u32 (!%p718_p8), 1, %s640_s13  }
  0x5f   : > { %s396_s24 = sshll.u32 (!%p718_p8), %s848_s17, 2  ;;  %s179_s22 = scalar_lea.sflag (!%p718_p8), [#allocation3], %s848_s17 }
  0x60   : > { %s182_s29 = scalar_lea.vmem (!%p718_p8), [#allocation2], %s396_s24  ;;  %p922_p4 = scmp.ne.s32.totalorder (!%p718_p8), %s915_s18, 0 }
  0x65   : > { %623 = dma.done.wait (%p922_p4), %s179_s22, 64  }
  0x66   : > { %625 = vsyncadd (%p922_p4), %s179_s22, 4294967232  ;;  %p923_p5 = scmp.eq.s32.totalorder %s699_s16, 0 }
  0x68   : > { %627 = dma.done.wait (%p923_p5), [#allocation6], 272   ;;  %p924_p11 = pmov %p923_p5 }
  0x69   : > { %v655_v0 = vmov 0.0   ;;  %vm656_vm0 = vmmov 0   ;;  %v490_v1 = vld [vmem:[#allocation5] sm:$0xff]   ;;  %v491_v2 = vld [vmem:[#allocation5 + $0x8] sm:$0xff]   ;;  %v214_v3 = vld [vmem:[%s182_s29] sm:$0xf] }
  0x6a   : > { %629 = vsyncadd (%p924_p11), [#allocation6], 4294967024  ;;  %411 = vmatprep.subr.bf16.mxu0 %v655_v0  ;;  %415 = vmatprep.mubr.msk.bf16.mxu0 %vm656_vm0, %v655_v0  ;;  %vm238_vm1 = vcmask 261120   ;;  %v400_v4 = vld [vmem:[#allocation7] ss:$0 sm:$0xff]  ;;  %s405_s18 = sshll.u32 %s699_s16, 6 }
  0x6b   : > { %412 = vmatpush3.bf16.msra.mxu0 %v490_v1  ;;  %s212_s20 = scalar_lea.vmem [#allocation8], %s396_s24  ;;  %vm283_vm2 = vcmask 257024   ;;  %s864_s28 = scalar_lea.hbm %s911_s3, %s405_s18 }
  0x6c   : > { %413 = vmatprep.subr.bf16.mxu0 %v655_v0  ;;  %s299_s21 = sshll.u32 %s212_s20, 4  ;;  %s286_s16 = scalar_lea.sflag [#allocation4], %s848_s17  ;;  %s866_s21 = int_to_ptr.vmem [resolvable:$true] %s299_s21 }
  0x6d   : > { %s578_s30 = scalar_lea.vmem %s866_s21, 64  ;;  %p925_p0 = scmp.ne.s32.totalorder %s920_s7, 0 }
  0x6e   : > { %p579_p8 = scmp.ne.s32.totalorder %s866_s21, %s578_s30  ;;  %s657_s4 = smov [#allocation8]  }
  0x6f   : > { %414 = vmatpush3.bf16.msra.mxu0 %v491_v2  ;;  %s582_s23 = sshll.u32 %s657_s4, 4  ;;  %s583_s23 = int_to_ptr.vmem [resolvable:$false] %s582_s23 }
  0x70   : > { %p580_p1 = pnand %p579_p8, %p925_p0  ;;  %s584_s6 = scalar_lea.vmem %s583_s23, 128 }
  0x71   : > { %p585_p7 = scmp.lt.s32.totalorder %s866_s21, %s583_s23  ;;  %p586_p9 = scmp.lt.s32.totalorder %s584_s6, %s578_s30 }
  0x72   : > { %416 = vmatmul.mubr.msk.bf16.vlgmr.msra.gmra.mrb[0].mxu0 %vm238_vm1, %v214_v3  ;;  %p581_p3 = pneg %p580_p1 }
  0x73   : > { %p587_p12 = por %p586_p9, %p585_p7 }
  0x75   : > { %p588_p2 = pnand %p587_p12, %p581_p3 }
 0x145   : > { %v276_v5 = vpop.f32.mrb[0].mxu0 }
 0x146   : > { %v277_v6 = vadd.f32 %v400_v4, %v276_v5  ;;  %v417_v7 = vpop.f32.mrb[1].mxu0 }
 0x147   : > { %v279_v8 = vpop.f32.mrb[2].mxu0 }
 0x148   : > { %v282_v9 = vpack.c.bf16 %v277_v6, %v277_v6  ;;  %v418_v10 = vpop.f32.mrb[3].mxu0 }
 0x14a   : > { %284 = vst.msk [vmem:[%s212_s20] sm:$0xf] %vm283_vm2, %v282_v9 }
 0x14b   : > { %591 = shalt.err (!%p588_p2)
}
 0x14c   : > { %s592_s9 = scalar_lea.hbm %s864_s28, 64  ;;  %s596_s11 = scalar_lea.hbm %s911_s3, 128 }
 0x14d   : > { %p593_p13 = scmp.ne.s32.totalorder %s864_s28, %s592_s9  ;;  %p597_p4 = scmp.lt.u32.totalorder %s864_s28, %s911_s3 }
 0x14e   : > { %p598_p5 = scmp.lt.u32.totalorder %s596_s11, %s592_s9  ;;  %p600_p8 = scmp.lt.u32.totalorder %s592_s9, %s864_s28 }
 0x14f   : > { %p594_p6 = pnand %p593_p13, %p925_p0 }
 0x150   : > { %p599_p11 = por %p598_p5, %p597_p4 }
 0x151   : > { %p595_p10 = pneg %p594_p6 }
 0x152   : > { %p601_p1 = por %p600_p8, %p599_p11 }
 0x154   : > { %p602_p3 = pnand %p601_p1, %p595_p10 }
 0x156   : > { %605 = shalt.err (!%p602_p3)
}
 0x157   : > { %429 = dma.vmem_to_hbm [thread:$0]  (%p925_p0), %s866_s21, 64, %s864_s28, %s286_s16  }
 0x158 PF: > { %s311_s22 = sand.u32 1, %s636_s12   ;;  %p926_p7 = scmp.ne.s32.totalorder %s916_s19, 0 }
 0x159   : > { %p927_p9 = scmp.ge.s32.totalorder %s648_s15, 2  ;;  %s312_s29 = scalar_lea.sflag [#allocation4], %s311_s22 }
 0x15b   : > { %p443_p12 = pnand %p927_p9, %p926_p7 }
 0x15d   : > { %631 = dma.done.wait (!%p443_p12), %s312_s29, 64  }
 0x15e   : > { %633 = vsyncadd (!%p443_p12), %s312_s29, 4294967232  ;;  %p17_p2 = scmp.ge.s32.totalorder %s789_s5, 4   ;;  %s928_s12 = smov %s640_s13 }
 0x15f   : > { %s929_s13 = smov %s644_s14  ;;  %s930_s14 = smov %s805_s8 }
 0x160   : > { %s931_s15 = smov %s789_s5  ;;  %19 = sbr.rel (!%p17_p2) target bundleno = 6 (0x6), region = 85 }
 0x167   :  { %317 = vsyncpa [#allocation3], 1 }
 0x168   :  { %319 = vsyncpa [#allocation3 + $0x1], 1 }
 0x169   :  { %320 = vsyncpa [#allocation6], 1 }
 0x16a   :  { %321 = vsyncpa [#allocation4], 1 }
 0x16b   :  { %323 = vsyncpa [#allocation4 + $0x1], 1 }

</bundles_post_ra>
